<compile_context>
chip_gen: v7x
topology: tpu7x:2x2x1
jax: 0.10.0
libtpu: 0.0.40
codegen_flags: <defaults>
</compile_context>

<pallas_src>
import math
import jax
import jax.numpy as jnp
from jax.experimental import pallas as pl
from jax.experimental.pallas import tpu as pltpu


def _pick_bt(B, C, HW, itemsize):
    """Generation-aware batch-tile (images per grid step) selection."""
    per_img_stream = 6 * C * HW * itemsize            # x1, x2, out, each double-buffered
    try:
        cap = int(pltpu.get_tpu_info().vmem_capacity_bytes)
    except Exception:
        cap = 64 << 20                                 # conservative (v7x physical)
    try:
        kind = jax.devices()[0].device_kind.lower()
    except Exception:
        kind = ""
    min_grid = 2 if "v7" in kind else 1                # keep both v7x TensorCores busy
    budget = min(cap // 4, 12 << 20)                   # streamed-block VMEM budget
    bt = 1
    for cand in range(1, B + 1):
        if B % cand:
            continue
        if cand > 16:                                  # keep block-diag constants modest
            break
        if (cand * C) * (cand * C) * 4 > (4 << 20):    # ECA block-diag matrix is (bt*C)^2 f32
            break
        if cand * per_img_stream > budget:
            break
        if (B // cand) < min_grid and cand > 1:
            continue
        bt = cand
    return bt


def attention_model_pallas(x1, x2, w1d, w1, bn_scale, bn_bias, wh, ww, *, bt=None):
    B, C, H, W = x1.shape
    HW = H * W
    Cr = w1.shape[0]
    K = w1d.shape[0]
    p = (K - 1) // 2
    f32 = jnp.float32
    itemsize = x1.dtype.itemsize

    # Lane-dense / free-view assumptions (flagged in the review): assert them.
    assert C % 8 == 0, "channel count must be a multiple of 8 for the lane-dense flatten"
    assert HW % 128 == 0, "H*W must be a multiple of 128 for lane-dense blocks"

    if bt is None:
        bt = _pick_bt(B, C, HW, itemsize)
    assert B % bt == 0
    grid = (B // bt,)
    BtC = bt * C
    Crp = ((Cr + 7) // 8) * 8          # pad reduced channels to a full sublane tile
    BtCr = bt * Crp

    # lane-dense (B*C, HW) layout for the streamed tensors (built in the wrapper)
    x1f = x1.reshape(B * C, HW)
    x2f = x2.reshape(B * C, HW)

    # ---------------- constants (built once in the wrapper) ----------------
    # ECA banded conv: y[i] = sum_k w1d[k - i + p] * xm[k]  (cross-correlation, zero pad)
    i_idx = jnp.arange(C)[:, None]
    k_idx = jnp.arange(C)[None, :]
    j = k_idx - i_idx + p
    mecaT = jnp.where((j >= 0) & (j < K), w1d.astype(f32)[jnp.clip(j, 0, K - 1)], 0.0)
    mecaBD = jnp.kron(jnp.eye(bt, dtype=f32), mecaT)                  # (bt*C, bt*C)

    # 1x1 conv with BN scale folded in, padded to Crp rows, block-diag over the batch tile
    w1b = (bn_scale[:, None] * w1).astype(f32)                        # (Cr, C)
    w1p = jnp.zeros((Crp, C), f32).at[:Cr].set(w1b)
    w1bd = jnp.kron(jnp.eye(bt, dtype=f32), w1p)                      # (bt*Crp, bt*C)
    bias = jnp.zeros((Crp, 1), f32).at[:Cr, 0].set(bn_bias.astype(f32))
    biasT = jnp.tile(bias, (bt, 1))                                   # (bt*Crp, 1)

    # F_h / F_w projections, padded to Crp columns, block-diag over the batch tile
    whp = jnp.zeros((C, Crp), f32).at[:, :Cr].set(wh.astype(f32))
    wwp = jnp.zeros((C, Crp), f32).at[:, :Cr].set(ww.astype(f32))
    whbd = jnp.kron(jnp.eye(bt, dtype=f32), whp)                      # (bt*C, bt*Crp)
    wwbd = jnp.kron(jnp.eye(bt, dtype=f32), wwp)                      # (bt*C, bt*Crp)

    # fused pooling matrix [mean-over-W | mean-over-H] and block-diag expansion matrix
    s = jnp.arange(HW)
    h_of = s // W
    w_of = s % W
    ph = (h_of[:, None] == jnp.arange(H)[None, :]).astype(f32) / W    # (HW, H)
    pw = (w_of[:, None] == jnp.arange(W)[None, :]).astype(f32) / H    # (HW, W)
    poolM = jnp.concatenate([ph, pw], axis=1)                         # (HW, H+W)
    eh = (jnp.arange(H)[:, None] == h_of[None, :]).astype(f32)        # (H, HW)
    ew = (jnp.arange(W)[:, None] == w_of[None, :]).astype(f32)        # (W, HW)
    egate = jnp.zeros((H + W, 2 * HW), f32)
    egate = egate.at[:H, :HW].set(eh).at[H:, HW:].set(ew)             # (H+W, 2*HW)

    # ---------------- kernel (fully batched over the bt-image slab) ----------------
    def kernel(x1_ref, x2_ref, meca_ref, w1bd_ref, bias_ref, whbd_ref, wwbd_ref,
               pool_ref, eg_ref, o_ref):
        x1b = x1_ref[...]                                             # (bt*C, HW) native dtype
        x2b = x2_ref[...]

        # ---- channel_att: one banded block-diag matmul on the column of means ----
        xm = jnp.mean(x1b, axis=1, keepdims=True, dtype=f32)          # (bt*C, 1)
        gate = jax.nn.sigmoid(
            jnp.dot(meca_ref[...], xm, preferred_element_type=f32))   # (bt*C, 1)
        zb = x1b * gate.astype(x1b.dtype) + x2b                       # (bt*C, HW)

        # ---- local_att: fused pool -> 1x1 conv(+BN+ReLU) -> F_h/F_w -> expand ----
        pool = jnp.dot(zb, pool_ref[...].astype(zb.dtype),
                       preferred_element_type=f32)                    # (bt*C, H+W)
        t = jnp.maximum(
            jnp.dot(w1bd_ref[...], pool, preferred_element_type=f32) + bias_ref[...],
            0.0)                                                      # (bt*Crp, H+W)
        sh = jax.nn.sigmoid(
            jnp.dot(whbd_ref[...], t[:, :H], preferred_element_type=f32))   # (bt*C, H)
        sw = jax.nn.sigmoid(
            jnp.dot(wwbd_ref[...], t[:, H:], preferred_element_type=f32))   # (bt*C, W)
        g2 = jnp.dot(jnp.concatenate([sh, sw], axis=1), eg_ref[...],
                     preferred_element_type=f32)                      # (bt*C, 2*HW)
        # slices at lane offset HW (multiple of 128) are free views
        o_ref[...] = (zb * g2[:, :HW] * g2[:, HW:]).astype(o_ref.dtype)

    # ---------------- VMEM limit + cost estimate ----------------
    streamed = 6 * BtC * HW * itemsize
    const_bytes = 2 * 4 * (BtC * BtC + BtCr * BtC + BtCr
                           + 2 * BtC * BtCr + HW * (H + W) + (H + W) * 2 * HW)
    interm = 4 * BtC * HW * 4
    est = streamed + const_bytes + interm
    try:
        cap = int(pltpu.get_tpu_info().vmem_capacity_bytes)
    except Exception:
        cap = 64 << 20
    vmem_limit = int(min(cap * 3 // 4, max(32 << 20, 2 * est)))

    steps = B // bt
    flops_step = 2 * (BtC * BtC                       # ECA band
                      + BtC * HW * (H + W)            # fused pooling
                      + BtCr * BtC * (H + W)          # 1x1 conv
                      + BtC * BtCr * (H + W)          # F_h / F_w
                      + BtC * (H + W) * 2 * HW)       # gate expansion
    cost = pl.CostEstimate(flops=int(steps * flops_step),
                           transcendentals=int(B * C * (H + W + 1)),
                           bytes_accessed=int(3 * B * C * HW * itemsize))

    out = pl.pallas_call(
        kernel,
        out_shape=jax.ShapeDtypeStruct((B * C, HW), x1.dtype),
        grid=grid,
        in_specs=[
            pl.BlockSpec((BtC, HW), lambda i: (i, 0)),
            pl.BlockSpec((BtC, HW), lambda i: (i, 0)),
            pl.BlockSpec((BtC, BtC), lambda i: (0, 0)),
            pl.BlockSpec((BtCr, BtC), lambda i: (0, 0)),
            pl.BlockSpec((BtCr, 1), lambda i: (0, 0)),
            pl.BlockSpec((BtC, BtCr), lambda i: (0, 0)),
            pl.BlockSpec((BtC, BtCr), lambda i: (0, 0)),
            pl.BlockSpec((HW, H + W), lambda i: (0, 0)),
            pl.BlockSpec((H + W, 2 * HW), lambda i: (0, 0)),
        ],
        out_specs=pl.BlockSpec((BtC, HW), lambda i: (i, 0)),
        compiler_params=pltpu.CompilerParams(
            dimension_semantics=("parallel",),
            vmem_limit_bytes=vmem_limit),
        cost_estimate=cost,
    )(x1f, x2f, mecaBD, w1bd, biasT, whbd, wwbd, poolM, egate)
    return out.reshape(B, C, H, W)


def attention_model_reference(x1, x2, w1d, w1, bn_scale, bn_bias, wh, ww):
    """Pure-JAX reference mirroring the PyTorch forward (BN in eval mode)."""
    B, C, H, W = x1.shape
    K = w1d.shape[0]
    p = (K - 1) // 2
    # channel_att
    xm = jnp.mean(x1, axis=(2, 3))                        # (B, C)
    xp = jnp.pad(xm, ((0, 0), (p, p)))
    y = sum(w1d[j] * xp[:, j:j + C] for j in range(K))
    gate = jax.nn.sigmoid(y)[:, :, None, None]
    z = x1 * gate + x2
    # local_att
    zh = jnp.mean(z, axis=3)                              # (B, C, H)
    zw = jnp.mean(z, axis=2)                              # (B, C, W)
    th = jnp.einsum('rc,bch->brh', w1, zh)
    tw = jnp.einsum('rc,bcw->brw', w1, zw)
    th = jnp.maximum(th * bn_scale[None, :, None] + bn_bias[None, :, None], 0.0)
    tw = jnp.maximum(tw * bn_scale[None, :, None] + bn_bias[None, :, None], 0.0)
    sh = jax.nn.sigmoid(jnp.einsum('cr,brh->bch', wh, th))
    sw = jax.nn.sigmoid(jnp.einsum('cr,brw->bcw', ww, tw))
    return z * sh[:, :, :, None] * sw[:, :, None, :]


if __name__ == "__main__":
    B, C, H, W = 2, 32, 16, 16          # ch=32 -> reduction 16 -> Cr=2, ECA kernel=3
    reduction = 16
    Cr = C // reduction

    # ECA 1-D conv kernel size (same formula as the PyTorch module)
    ks = int(abs((math.log(C, 2) + 1) / 2))
    ks = ks if ks % 2 else ks + 1

    key = jax.random.PRNGKey(0)
    k_x1, k_x2, k_w1d, k_w1, k_wh, k_ww = jax.random.split(key, 6)

    x1 = jax.random.normal(k_x1, (B, C, H, W), jnp.float32)
    x2 = jax.random.normal(k_x2, (B, C, H, W), jnp.float32)

    # deterministic synthetic parameters
    w1d = jax.random.normal(k_w1d, (ks,), jnp.float32) * 0.5           # Conv1d(1,1,ks) weight
    w1 = jax.random.normal(k_w1, (Cr, C), jnp.float32) / math.sqrt(C)  # conv_1x1 weight
    wh = jax.random.normal(k_wh, (C, Cr), jnp.float32) / math.sqrt(Cr)
    ww = jax.random.normal(k_ww, (C, Cr), jnp.float32) / math.sqrt(Cr)

    # BatchNorm2d(Cr) params (eval mode), folded to scale / bias
    gamma = 1.0 + 0.1 * jnp.arange(Cr, dtype=jnp.float32)
    beta = 0.05 * jnp.arange(Cr, dtype=jnp.float32)
    run_mean = 0.01 * jnp.arange(Cr, dtype=jnp.float32)
    run_var = 1.0 + 0.1 * jnp.arange(Cr, dtype=jnp.float32)
    eps = 1e-5
    bn_scale = gamma / jnp.sqrt(run_var + eps)
    bn_bias = beta - run_mean * bn_scale

    out = attention_model_pallas(x1, x2, w1d, w1, bn_scale, bn_bias, wh, ww)
    out = jax.block_until_ready(out)

    ref = attention_model_reference(x1, x2, w1d, w1, bn_scale, bn_bias, wh, ww)
    assert out.shape == (B, C, H, W)
    assert jnp.allclose(out, ref, rtol=1e-2, atol=1e-2), "Pallas output mismatch vs reference"

    print("KERNEL_OK")
</pallas_src>

<mosaic_0001>
module attributes {stable_mosaic.version = 11 : i64} {
  func.func @kernel(%arg0: i32, %arg1: memref<64x256xf32, #tpu.memory_space<vmem>>, %arg2: memref<64x256xf32, #tpu.memory_space<vmem>>, %arg3: memref<64x64xf32, #tpu.memory_space<vmem>>, %arg4: memref<16x64xf32, #tpu.memory_space<vmem>>, %arg5: memref<16x1xf32, #tpu.memory_space<vmem>>, %arg6: memref<64x16xf32, #tpu.memory_space<vmem>>, %arg7: memref<64x16xf32, #tpu.memory_space<vmem>>, %arg8: memref<256x32xf32, #tpu.memory_space<vmem>>, %arg9: memref<32x512xf32, #tpu.memory_space<vmem>>, %arg10: memref<64x256xf32, #tpu.memory_space<vmem>>) attributes {dimension_semantics = [#tpu.dimension_semantics<parallel>], iteration_bounds = array<i64: 1>, scalar_prefetch = 0 : i64, scratch_operands = 0 : i64, tpu.core_type = #tpu.core_type<tc>, window_params = [{transform_indices = @transform_0, window_bounds = array<i64: 64, 256>}, {transform_indices = @transform_1, window_bounds = array<i64: 64, 256>}, {pipeline_mode = #tpu.pipeline_mode<synchronous>, transform_indices = @transform_2, window_bounds = array<i64: 64, 64>}, {pipeline_mode = #tpu.pipeline_mode<synchronous>, transform_indices = @transform_3, window_bounds = array<i64: 16, 64>}, {pipeline_mode = #tpu.pipeline_mode<synchronous>, transform_indices = @transform_4, window_bounds = array<i64: 16, 1>}, {pipeline_mode = #tpu.pipeline_mode<synchronous>, transform_indices = @transform_5, window_bounds = array<i64: 64, 16>}, {pipeline_mode = #tpu.pipeline_mode<synchronous>, transform_indices = @transform_6, window_bounds = array<i64: 64, 16>}, {pipeline_mode = #tpu.pipeline_mode<synchronous>, transform_indices = @transform_7, window_bounds = array<i64: 256, 32>}, {pipeline_mode = #tpu.pipeline_mode<synchronous>, transform_indices = @transform_8, window_bounds = array<i64: 32, 512>}, {transform_indices = @transform_9, window_bounds = array<i64: 64, 256>}]} {
    %c0 = arith.constant 0 : index
    %c0_0 = arith.constant 0 : index
    %0 = vector.load %arg1[%c0, %c0_0] : memref<64x256xf32, #tpu.memory_space<vmem>>, vector<64x256xf32>
    %c0_1 = arith.constant 0 : index
    %c0_2 = arith.constant 0 : index
    %1 = vector.load %arg2[%c0_1, %c0_2] : memref<64x256xf32, #tpu.memory_space<vmem>>, vector<64x256xf32>
    %cst = arith.constant dense<0.000000e+00> : vector<64xf32>
    %2 = vector.multi_reduction <add>, %0, %cst [1] : vector<64x256xf32> to vector<64xf32>
    %3 = vector.shape_cast %2 : vector<64xf32> to vector<64x1xf32>
    %cst_3 = arith.constant 2.560000e+02 : f32
    %4 = vector.broadcast %cst_3 : f32 to vector<64x1xf32>
    %5 = arith.divf %3, %4 : vector<64x1xf32>
    %c0_4 = arith.constant 0 : index
    %c0_5 = arith.constant 0 : index
    %6 = vector.load %arg3[%c0_4, %c0_5] : memref<64x64xf32, #tpu.memory_space<vmem>>, vector<64x64xf32>
    %cst_6 = arith.constant dense<0.000000e+00> : vector<64x1xf32>
    %7 = tpu.matmul %6, %5, %cst_6 {dimension_numbers = #tpu.dot_dimension_numbers<[1], [0], [0], [1], [0, 0, 1, 1], [], []>} : vector<64x64xf32>, vector<64x1xf32>, vector<64x1xf32> -> vector<64x1xf32>
    %8 = arith.negf %7 : vector<64x1xf32>
    %9 = math.exp %8 : vector<64x1xf32>
    %cst_7 = arith.constant 1.000000e+00 : f32
    %10 = vector.broadcast %cst_7 : f32 to vector<64x1xf32>
    %11 = arith.addf %10, %9 : vector<64x1xf32>
    %12 = arith.divf %10, %11 : vector<64x1xf32>
    %13 = vector.broadcast %12 : vector<64x1xf32> to vector<64x256xf32>
    %14 = arith.mulf %0, %13 : vector<64x256xf32>
    %15 = arith.addf %14, %1 : vector<64x256xf32>
    %c0_8 = arith.constant 0 : index
    %c0_9 = arith.constant 0 : index
    %16 = vector.load %arg8[%c0_8, %c0_9] : memref<256x32xf32, #tpu.memory_space<vmem>>, vector<256x32xf32>
    %cst_10 = arith.constant dense<0.000000e+00> : vector<64x32xf32>
    %17 = tpu.matmul %15, %16, %cst_10 {dimension_numbers = #tpu.dot_dimension_numbers<[1], [0], [0], [1], [0, 0, 1, 1], [], []>} : vector<64x256xf32>, vector<256x32xf32>, vector<64x32xf32> -> vector<64x32xf32>
    %c0_11 = arith.constant 0 : index
    %c0_12 = arith.constant 0 : index
    %18 = vector.load %arg4[%c0_11, %c0_12] : memref<16x64xf32, #tpu.memory_space<vmem>>, vector<16x64xf32>
    %cst_13 = arith.constant dense<0.000000e+00> : vector<16x32xf32>
    %19 = tpu.matmul %18, %17, %cst_13 {dimension_numbers = #tpu.dot_dimension_numbers<[1], [0], [0], [1], [0, 0, 1, 1], [], []>} : vector<16x64xf32>, vector<64x32xf32>, vector<16x32xf32> -> vector<16x32xf32>
    %c0_14 = arith.constant 0 : index
    %c0_15 = arith.constant 0 : index
    %20 = vector.load %arg5[%c0_14, %c0_15] : memref<16x1xf32, #tpu.memory_space<vmem>>, vector<16x1xf32>
    %21 = vector.broadcast %20 : vector<16x1xf32> to vector<16x32xf32>
    %22 = arith.addf %19, %21 : vector<16x32xf32>
    %cst_16 = arith.constant 0.000000e+00 : f32
    %23 = vector.broadcast %cst_16 : f32 to vector<16x32xf32>
    %24 = arith.maximumf %22, %23 : vector<16x32xf32>
    %c0_17 = arith.constant 0 : index
    %c0_18 = arith.constant 0 : index
    %25 = vector.load %arg6[%c0_17, %c0_18] : memref<64x16xf32, #tpu.memory_space<vmem>>, vector<64x16xf32>
    %26 = vector.extract_strided_slice %24 {offsets = [0, 0], sizes = [16, 16], strides = [1, 1]} : vector<16x32xf32> to vector<16x16xf32>
    %cst_19 = arith.constant dense<0.000000e+00> : vector<64x16xf32>
    %27 = tpu.matmul %25, %26, %cst_19 {dimension_numbers = #tpu.dot_dimension_numbers<[1], [0], [0], [1], [0, 0, 1, 1], [], []>} : vector<64x16xf32>, vector<16x16xf32>, vector<64x16xf32> -> vector<64x16xf32>
    %28 = arith.negf %27 : vector<64x16xf32>
    %29 = math.exp %28 : vector<64x16xf32>
    %cst_20 = arith.constant 1.000000e+00 : f32
    %30 = vector.broadcast %cst_20 : f32 to vector<64x16xf32>
    %31 = arith.addf %30, %29 : vector<64x16xf32>
    %32 = arith.divf %30, %31 : vector<64x16xf32>
    %c0_21 = arith.constant 0 : index
    %c0_22 = arith.constant 0 : index
    %33 = vector.load %arg7[%c0_21, %c0_22] : memref<64x16xf32, #tpu.memory_space<vmem>>, vector<64x16xf32>
    %34 = vector.extract_strided_slice %24 {offsets = [0, 16], sizes = [16, 16], strides = [1, 1]} : vector<16x32xf32> to vector<16x16xf32>
    %cst_23 = arith.constant dense<0.000000e+00> : vector<64x16xf32>
    %35 = tpu.matmul %33, %34, %cst_23 {dimension_numbers = #tpu.dot_dimension_numbers<[1], [0], [0], [1], [0, 0, 1, 1], [], []>} : vector<64x16xf32>, vector<16x16xf32>, vector<64x16xf32> -> vector<64x16xf32>
    %36 = arith.negf %35 : vector<64x16xf32>
    %37 = math.exp %36 : vector<64x16xf32>
    %cst_24 = arith.constant 1.000000e+00 : f32
    %38 = vector.broadcast %cst_24 : f32 to vector<64x16xf32>
    %39 = arith.addf %38, %37 : vector<64x16xf32>
    %40 = arith.divf %38, %39 : vector<64x16xf32>
    %41 = tpu.concatenate %32, %40 in 1 : vector<64x16xf32>, vector<64x16xf32> -> vector<64x32xf32>
    %c0_25 = arith.constant 0 : index
    %c0_26 = arith.constant 0 : index
    %42 = vector.load %arg9[%c0_25, %c0_26] : memref<32x512xf32, #tpu.memory_space<vmem>>, vector<32x512xf32>
    %cst_27 = arith.constant dense<0.000000e+00> : vector<64x512xf32>
    %43 = tpu.matmul %41, %42, %cst_27 {dimension_numbers = #tpu.dot_dimension_numbers<[1], [0], [0], [1], [0, 0, 1, 1], [], []>} : vector<64x32xf32>, vector<32x512xf32>, vector<64x512xf32> -> vector<64x512xf32>
    %44 = vector.extract_strided_slice %43 {offsets = [0, 0], sizes = [64, 256], strides = [1, 1]} : vector<64x512xf32> to vector<64x256xf32>
    %45 = arith.mulf %15, %44 : vector<64x256xf32>
    %46 = vector.extract_strided_slice %43 {offsets = [0, 256], sizes = [64, 256], strides = [1, 1]} : vector<64x512xf32> to vector<64x256xf32>
    %47 = arith.mulf %45, %46 : vector<64x256xf32>
    %c0_28 = arith.constant 0 : index
    %c0_29 = arith.constant 0 : index
    %48 = vector.load %arg10[%c0_28, %c0_29] : memref<64x256xf32, #tpu.memory_space<vmem>>, vector<64x256xf32>
    tpu.vector_store %arg10[%c0_28, %c0_29], %47 {strides = array<i32>} : memref<64x256xf32, #tpu.memory_space<vmem>>, vector<64x256xf32>,
    return
  }
  func.func @transform_0(%arg0: i32) -> (i32, i32) {
    %c0_i32 = arith.constant 0 : i32
    %c0_i32_0 = arith.constant 0 : i32
    return %arg0, %c0_i32 : i32, i32
  }
  func.func @transform_1(%arg0: i32) -> (i32, i32) {
    %c0_i32 = arith.constant 0 : i32
    %c0_i32_0 = arith.constant 0 : i32
    return %arg0, %c0_i32 : i32, i32
  }
  func.func @transform_2(%arg0: i32) -> (i32, i32) {
    %c0_i32 = arith.constant 0 : i32
    %c0_i32_0 = arith.constant 0 : i32
    %c0_i32_1 = arith.constant 0 : i32
    return %c0_i32, %c0_i32_0 : i32, i32
  }
  func.func @transform_3(%arg0: i32) -> (i32, i32) {
    %c0_i32 = arith.constant 0 : i32
    %c0_i32_0 = arith.constant 0 : i32
    %c0_i32_1 = arith.constant 0 : i32
    return %c0_i32, %c0_i32_0 : i32, i32
  }
  func.func @transform_4(%arg0: i32) -> (i32, i32) {
    %c0_i32 = arith.constant 0 : i32
    %c0_i32_0 = arith.constant 0 : i32
    %c0_i32_1 = arith.constant 0 : i32
    return %c0_i32, %c0_i32_0 : i32, i32
  }
  func.func @transform_5(%arg0: i32) -> (i32, i32) {
    %c0_i32 = arith.constant 0 : i32
    %c0_i32_0 = arith.constant 0 : i32
    %c0_i32_1 = arith.constant 0 : i32
    return %c0_i32, %c0_i32_0 : i32, i32
  }
  func.func @transform_6(%arg0: i32) -> (i32, i32) {
    %c0_i32 = arith.constant 0 : i32
    %c0_i32_0 = arith.constant 0 : i32
    %c0_i32_1 = arith.constant 0 : i32
    return %c0_i32, %c0_i32_0 : i32, i32
  }
  func.func @transform_7(%arg0: i32) -> (i32, i32) {
    %c0_i32 = arith.constant 0 : i32
    %c0_i32_0 = arith.constant 0 : i32
    %c0_i32_1 = arith.constant 0 : i32
    return %c0_i32, %c0_i32_0 : i32, i32
  }
  func.func @transform_8(%arg0: i32) -> (i32, i32) {
    %c0_i32 = arith.constant 0 : i32
    %c0_i32_0 = arith.constant 0 : i32
    %c0_i32_1 = arith.constant 0 : i32
    return %c0_i32, %c0_i32_0 : i32, i32
  }
  func.func @transform_9(%arg0: i32) -> (i32, i32) {
    %c0_i32 = arith.constant 0 : i32
    %c0_i32_0 = arith.constant 0 : i32
    return %arg0, %c0_i32 : i32, i32
  }
}

</mosaic_0001>

<bundles_post_ra>
// kernel: tpu_custom_call.1
= control target key start
LH: loop header
LB: loop body
LE: loop exit
PB: predicated region body
PF: predicated region fallthrough
CT: control target
= control target key end

     0   :  { %14 = vsyncpa [#allocation3], 0  ;;  %s2460_s0 = inlined_call_operand.vmem [shape: f32[64,256], index: 0, kind: input, shape index: {}]   ;;  %s2461_s1 = inlined_call_operand.vmem [shape: f32[64,256], index: 1, kind: input, shape index: {}]   ;;  %s2462_s2 = inlined_call_operand.hbm [shape: f32[64,64], index: 2, kind: input, shape index: {}]   ;;  %s2463_s3 = inlined_call_operand.vmem [shape: f32[16,64], index: 3, kind: input, shape index: {}]   ;;  %s2464_s4 = inlined_call_operand.vmem [shape: f32[16,1], index: 4, kind: input, shape index: {}]   ;;  %s2465_s5 = inlined_call_operand.vmem [shape: f32[64,16], index: 5, kind: input, shape index: {}]   ;;  %s2466_s6 = inlined_call_operand.vmem [shape: f32[64,16], index: 6, kind: input, shape index: {}]   ;;  %s2467_s7 = inlined_call_operand.vmem [shape: f32[256,32], index: 7, kind: input, shape index: {}]   ;;  %s2468_s8 = inlined_call_operand.vmem [shape: f32[32,512], index: 8, kind: input, shape index: {}]   ;;  %s2469_s9 = inlined_call_operand.hbm [shape: f32[64,256], index: 9, kind: output, shape index: {}]  }
   0x1   :  { %15 = vsyncpa [#allocation4], 0  ;;  %s1850_s30 = smov [#allocation2]   ;;  %s1802_s13 = scalar_lea.hbm %s2462_s2, 1024 }
   0x2   :  { %s25_s10 = sshll.u32 %s1850_s30, 4  ;;  %p1803_p0 = scmp.ne.s32.totalorder %s2462_s2, %s1802_s13  ;;  %s26_s10 = int_to_ptr.vmem [resolvable:$true] %s25_s10 }
   0x3   :  { %p1806_p1 = scmp.lt.u32.totalorder %s1802_s13, %s2462_s2 }
   0x5   :  { %p1808_p2 = pnand %p1806_p1, %p1803_p0 }
   0x7   :  { %1811 = shalt.err (!%p1808_p2)
}
   0x8   :  { %s1812_s18 = scalar_lea.vmem %s26_s10, 1024  ;;  %p1817_p4 = scmp.lt.s32.totalorder %s26_s10, %s26_s10 }
   0x9   :  { %p1813_p3 = scmp.ne.s32.totalorder %s26_s10, %s1812_s18  ;;  %p1818_p5 = scmp.lt.s32.totalorder %s1812_s18, %s1812_s18 }
   0xb   :  { %p1819_p6 = por %p1818_p5, %p1817_p4 }
   0xd   :  { %p1820_p7 = pnand %p1819_p6, %p1813_p3 }
   0xf   :  { %1823 = shalt.err (!%p1820_p7)
}
  0x10   :  { %s1851_s19 = smov 128   ;;  %s1852_s20 = smov 8  }
  0x11   :  { %31 = dma.hbm_to_vmem [thread:$0]  %s2462_s2, 1024, %s26_s10, [#allocation3], %s1851_s19, %s1851_s19, %s1852_s20  }
  0x12   :  { %1846 = dma.done.wait [#allocation3], 1024  }
  0x13   :  { %1847 = vsyncadd [#allocation3], 4294966272  ;;  %v1924_v0 = vld [vmem:[%s2460_s0 + $0x20] sm:$0xff]  ;;  %v1929_v1 = vld [vmem:[%s2460_s0 + $0x28] sm:$0xff]  ;;  %vm120_vm0 = vcmask 523264   ;;  %v1853_v52 = vmov 0  }
  0x14   :  { %v1934_v2 = vld [vmem:[%s2460_s0] sm:$0xff]  ;;  %v85_v3 = vadd.f32 %v1929_v1, %v1924_v0  ;;  %v1941_v4 = vld [vmem:[%s2460_s0 + $0x8] sm:$0xff]  ;;  %v1946_v5 = vld [vmem:[%s2460_s0 + $0x30] sm:$0xff]  ;;  %1700 = vset.pattern.permute.xlu1 %v1853_v52  ;;  %1699 = vset.pattern.permute.xlu0 %v1853_v52  ;;  %vm612_vm1 = vcmask 130048   ;;  %vm1039_vm2 = vcmask 261120   ;;  %s1857_s23 = smov [#allocation5]  }
  0x15   :  { %v1951_v6 = vld [vmem:[%s2460_s0 + $0x38] sm:$0xff]  ;;  %v79_v7 = vadd.f32 %v1941_v4, %v1934_v2  ;;  %v1958_v8 = vld [vmem:[%s2460_s0 + $0x10] sm:$0xff]  ;;  %v1982_v14 = vld [vmem:[%s2460_s0 + $0x40] sm:$0xff]  ;;  %s1343_s24 = sshll.u32 %s1857_s23, 4  ;;  %s1344_s24 = int_to_ptr.vmem [resolvable:$true] %s1343_s24 }
  0x16   :  { %v1963_v9 = vld [vmem:[%s2460_s0 + $0x18] sm:$0xff]  ;;  %86 = vadd.xlane.f32.xlu1 %v85_v3  ;;  %v88_v10 = vadd.f32 %v1951_v6, %v1946_v5  ;;  %v1972_v12 = vld [vmem:[%s2460_s0 + $0x50] sm:$0xff]  ;;  %v1987_v15 = vld [vmem:[%s2460_s0 + $0x48] sm:$0xff]  ;;  %s1824_s25 = scalar_lea.vmem %s1344_s24, 2048  ;;  %p1829_p9 = scmp.lt.s32.totalorder %s1344_s24, %s1344_s24 }
  0x17   :  { %80 = vadd.xlane.f32.xlu0 %v79_v7  ;;  %v82_v11 = vadd.f32 %v1963_v9, %v1958_v8  ;;  %v1977_v13 = vld [vmem:[%s2460_s0 + $0x58] sm:$0xff]  ;;  %v91_v17 = vadd.f32 %v1987_v15, %v1982_v14  ;;  %v1996_v18 = vld [vmem:[%s2460_s0 + $0x70] sm:$0xff]  ;;  %v2006_v20 = vld [vmem:[%s2460_s0 + $0x60] sm:$0xff]  ;;  %p1825_p8 = scmp.ne.s32.totalorder %s1344_s24, %s1824_s25  ;;  %p1830_p10 = scmp.lt.s32.totalorder %s1824_s25, %s1824_s25 }
  0x18   :  { %v94_v16 = vadd.f32 %v1977_v13, %v1972_v12  ;;  %v2001_v19 = vld [vmem:[%s2460_s0 + $0x78] sm:$0xff]  ;;  %v2011_v21 = vld [vmem:[%s2460_s0 + $0x68] sm:$0xff]  ;;  %v112_v24 = vld [vmem:[#allocation2] sm:$0xff] }
  0x19   :  { %v100_v22 = vadd.f32 %v2001_v19, %v1996_v18  ;;  %v97_v23 = vadd.f32 %v2011_v21, %v2006_v20  ;;  %1539 = vmatprep.mubr.msk.f32.mxu0 %vm120_vm0, %v112_v24  ;;  %v113_v45 = vld [vmem:[#allocation2 + $0x8] sm:$0xff]  ;;  %v114_v46 = vld [vmem:[#allocation2 + $0x10] sm:$0xff]  ;;  %v115_v47 = vld [vmem:[#allocation2 + $0x18] sm:$0xff]  ;;  %p1831_p11 = por %p1830_p10, %p1829_p9 }
  0x1a   :  { %89 = vadd.xlane.f32.xlu1 %v88_v10  ;;  %v116_v48 = vld [vmem:[#allocation2 + $0x20] sm:$0xff]  ;;  %v117_v49 = vld [vmem:[#allocation2 + $0x28] sm:$0xff]  ;;  %v118_v50 = vld [vmem:[#allocation2 + $0x30] sm:$0xff] }
  0x1b   :  { %83 = vadd.xlane.f32.xlu0 %v82_v11  ;;  %v119_v51 = vld [vmem:[#allocation2 + $0x38] sm:$0xff]  ;;  %v386_v53 = vld [vmem:[%s2467_s7 + $0x80] sm:$0xff]  ;;  %v387_v54 = vld [vmem:[%s2467_s7 + $0x88] sm:$0xff]  ;;  %p1832_p12 = pnand %p1831_p11, %p1825_p8 }
  0x1c   :  { %v370_v55 = vld [vmem:[%s2467_s7] sm:$0xff]  ;;  %v1618_v56 = vpack.c.bf16 %v387_v54, %v386_v53  ;;  %v371_v57 = vld [vmem:[%s2467_s7 + $0x8] sm:$0xff]  ;;  %v388_v58 = vld [vmem:[%s2467_s7 + $0x90] sm:$0xff] }
  0x1d   :  { %v389_v59 = vld [vmem:[%s2467_s7 + $0x98] sm:$0xff]  ;;  %v1620_v60 = vpack.c.bf16 %v371_v57, %v370_v55  ;;  %v372_v62 = vld [vmem:[%s2467_s7 + $0x10] sm:$0xff]  ;;  %v390_v3 = vld [vmem:[%s2467_s7 + $0xa0] sm:$0xff] }
  0x1e   :  { %95 = vadd.xlane.f32.xlu1 %v94_v16  ;;  %v1622_v61 = vpack.c.bf16 %v389_v59, %v388_v58  ;;  %v373_v63 = vld [vmem:[%s2467_s7 + $0x18] sm:$0xff]  ;;  %1619 = vmatprep.subr.bf16.mxu1 %v1618_v56  ;;  %v391_v7 = vld [vmem:[%s2467_s7 + $0xa8] sm:$0xff]  ;;  %v374_v16 = vld [vmem:[%s2467_s7 + $0x20] sm:$0xff] }
  0x1f   :  { %92 = vadd.xlane.f32.xlu0 %v91_v17  ;;  %1621 = vmatpush3.bf16.msra.mxu1 %v1620_v60  ;;  %v1624_v10 = vpack.c.bf16 %v373_v63, %v372_v62  ;;  %v1626_v11 = vpack.c.bf16 %v391_v7, %v390_v3  ;;  %v375_v17 = vld [vmem:[%s2467_s7 + $0x28] sm:$0xff] }
  0x20   :  { %1623 = vmatprep.subr.bf16.mxu1 %v1622_v61  ;;  %v1628_v24 = vpack.c.bf16 %v375_v17, %v374_v16 }
  0x22   :  { %101 = vadd.xlane.f32.xlu1 %v100_v22  ;;  %v392_v22 = vld [vmem:[%s2467_s7 + $0xb0] sm:$0xff] }
  0x23   :  { %98 = vadd.xlane.f32.xlu0 %v97_v23  ;;  %v393_v23 = vld [vmem:[%s2467_s7 + $0xb8] sm:$0xff]  ;;  %1625 = vmatpush3.bf16.msra.mxu1 %v1624_v10 }
  0x24   :  { %1627 = vmatprep.subr.bf16.mxu1 %v1626_v11 }
  0x27   :  { %1629 = vmatpush3.bf16.msra.mxu1 %v1628_v24 }
  0xa3   :  { %v87_v25 = vpop.xlane.xlu1 %86 }
  0xa4   :  { %v81_v26 = vpop.xlane.xlu0 %80  ;;  %v106_v29 = vmul.f32 0.00390625, %v87_v25  ;;  %v1630_v25 = vpack.c.bf16 %v393_v23, %v392_v22 }
  0xa5   :  { %v104_v30 = vmul.f32 0.00390625, %v81_v26  ;;  %v376_v26 = vld [vmem:[%s2467_s7 + $0x30] sm:$0xff] }
  0xa6   :  { %1631 = vmatprep.subr.bf16.mxu1 %v1630_v25 }
  0xa7   :  { %v90_v27 = vpop.xlane.xlu1 %89 }
  0xa8   :  { %v84_v28 = vpop.xlane.xlu0 %83  ;;  %v107_v31 = vmul.f32 0.00390625, %v90_v27  ;;  %v377_v27 = vld [vmem:[%s2467_s7 + $0x38] sm:$0xff] }
  0xa9   :  { %v105_v32 = vmul.f32 0.00390625, %v84_v28  ;;  %v394_v28 = vld [vmem:[%s2467_s7 + $0xc0] sm:$0xff] }
  0xaa   :  { %v1606_v37 = vpack.c.bf16 %v107_v31, %v106_v29  ;;  %v395_v29 = vld [vmem:[%s2467_s7 + $0xc8] sm:$0xff] }
  0xab   :  { %v1602_v33 = vpack.c.bf16 %v105_v32, %v104_v30  ;;  %v96_v34 = vpop.xlane.xlu1 %95  ;;  %v1632_v30 = vpack.c.bf16 %v377_v27, %v376_v26  ;;  %v1634_v31 = vpack.c.bf16 %v395_v29, %v394_v28  ;;  %v378_v32 = vld [vmem:[%s2467_s7 + $0x40] sm:$0xff]  ;;  %v400_v27 = vld [vmem:[%s2467_s7 + $0xf0] sm:$0xff]  ;;  %v401_v28 = vld [vmem:[%s2467_s7 + $0xf8] sm:$0xff] }
  0xac   :  { %v109_v35 = vmul.f32 0.00390625, %v96_v34  ;;  %v93_v36 = vpop.xlane.xlu0 %92  ;;  %v396_v34 = vld [vmem:[%s2467_s7 + $0xd0] sm:$0xff] }
  0xad   :  { %1603 = vmatprep.subr.bf16.mxu0 %v1602_v33  ;;  %v108_v38 = vmul.f32 0.00390625, %v93_v36  ;;  %1633 = vmatpush3.bf16.msra.mxu1 %v1632_v30 }
  0xae   :  { %1605 = vmatpush3.bf16.msra.mxu0 %v1602_v33  ;;  %v379_v33 = vld [vmem:[%s2467_s7 + $0x48] sm:$0xff]  ;;  %1635 = vmatprep.subr.bf16.mxu1 %v1634_v31  ;;  %v1646_v31 = vpack.c.bf16 %v401_v28, %v400_v27 }
  0xaf   :  { %1607 = vmatprep.subr.bf16.mxu0 %v1606_v37  ;;  %v1610_v39 = vpack.c.bf16 %v109_v35, %v108_v38  ;;  %v102_v40 = vpop.xlane.xlu1 %101  ;;  %v397_v35 = vld [vmem:[%s2467_s7 + $0xd8] sm:$0xff]  ;;  %v1636_v36 = vpack.c.bf16 %v379_v33, %v378_v32  ;;  %v380_v38 = vld [vmem:[%s2467_s7 + $0x50] sm:$0xff] }
  0xb0   :  { %v111_v41 = vmul.f32 0.00390625, %v102_v40  ;;  %v99_v42 = vpop.xlane.xlu0 %98  ;;  %v398_v40 = vld [vmem:[%s2467_s7 + $0xe0] sm:$0xff]  ;;  %v384_v32 = vld [vmem:[%s2467_s7 + $0x70] sm:$0xff]  ;;  %v385_v33 = vld [vmem:[%s2467_s7 + $0x78] sm:$0xff] }
  0xb1   :  { %v110_v43 = vmul.f32 0.00390625, %v99_v42  ;;  %1637 = vmatpush3.bf16.msra.mxu1 %v1636_v36  ;;  %v510_v36 = vld [vmem:[%s2464_s4 + $0x8] sm:$0xff] }
  0xb2   :  { %1609 = vmatpush3.bf16.msra.mxu0 %v1606_v37  ;;  %v1638_v37 = vpack.c.bf16 %v397_v35, %v396_v34  ;;  %v1648_v35 = vpack.c.bf16 %v385_v33, %v384_v32 }
  0xb3   :  { %v1614_v44 = vpack.c.bf16 %v111_v41, %v110_v43  ;;  %1611 = vmatprep.subr.bf16.mxu0 %v1610_v39  ;;  %v399_v41 = vld [vmem:[%s2467_s7 + $0xe8] sm:$0xff] }
  0xb4   :  { %1639 = vmatprep.subr.bf16.mxu1 %v1638_v37  ;;  %v1642_v43 = vpack.c.bf16 %v399_v41, %v398_v40 }
  0xb6   :  { %1613 = vmatpush3.bf16.msra.mxu0 %v1610_v39  ;;  %v381_v39 = vld [vmem:[%s2467_s7 + $0x58] sm:$0xff] }
  0xb7   :  { %1615 = vmatprep.subr.bf16.mxu0 %v1614_v44  ;;  %v1640_v42 = vpack.c.bf16 %v381_v39, %v380_v38 }
  0xb9   :  { %1641 = vmatpush3.bf16.msra.mxu1 %v1640_v42 }
  0xba   :  { %1617 = vmatpush3.bf16.msra.mxu0 %v1614_v44  ;;  %v382_v44 = vld [vmem:[%s2467_s7 + $0x60] sm:$0xff]  ;;  %1643 = vmatprep.subr.bf16.mxu1 %v1642_v43 }
  0xbd   :  { %1540 = vmatmul.mubr.msk.f32.vlgmr.msra.gmra.mrb[0].mxu0 %vm120_vm0, %v113_v45  ;;  %v383_v45 = vld [vmem:[%s2467_s7 + $0x68] sm:$0xff] }
  0xbe   :  { %1542 = vmatprep.mubr.msk.f32.mxu0 %vm120_vm0, %v114_v46  ;;  %v1644_v46 = vpack.c.bf16 %v383_v45, %v382_v44 }
  0xc0   :  { %1645 = vmatpush3.bf16.msra.mxu1 %v1644_v46  ;;  %v509_v46 = vld [vmem:[%s2464_s4] sm:$0xff] }
  0xc1   :  { %1543 = vmatmul.mubr.msk.f32.gmra.mrb[2].mxu0 %vm120_vm0, %v115_v47  ;;  %1647 = vmatprep.subr.bf16.mxu1 %v1646_v31  ;;  %v76_v31 = vld [vmem:[%s2461_s1 + $0x68] sm:$0xff] }
  0xc2   :  { %1545 = vmatprep.mubr.msk.f32.mxu0 %vm120_vm0, %v116_v48 }
  0xc4   :  { %1649 = vmatpush3.bf16.msra.mxu1 %v1648_v35 }
  0xc5   :  { %1546 = vmatmul.mubr.msk.f32.gmra.mrb[4].mxu0 %vm120_vm0, %v117_v49 }
  0xc6   :  { %1548 = vmatprep.mubr.msk.f32.mxu0 %vm120_vm0, %v118_v50 }
  0xc9   :  { %1549 = vmatmul.mubr.msk.f32.gmra.mrb[6].mxu0 %vm120_vm0, %v119_v51 }
 0x190   :  { %v1541_v47 = vpop.f32.mrb[0].mxu0 }
 0x191   :  { %v1364_v48 = vmul.f32 -1.442695, %v1541_v47  ;;  %v211_v49 = vpop.f32.mrb[1].mxu0 }
 0x192   :  { %v1363_v50 = vmul.f32 -1.442695, %v211_v49 }
 0x193   :  { %1706 = vpow2.f32 %v1364_v48  ;;  %v63_v48 = vld [vmem:[%s2461_s1] sm:$0xff] }
 0x194   :  { %1708 = vpow2.f32 %v1363_v50  ;;  %v1544_v51 = vpop.f32.mrb[2].mxu0  ;;  %v64_v50 = vld [vmem:[%s2461_s1 + $0x8] sm:$0xff] }
 0x195   :  { %v1366_v52 = vmul.f32 -1.442695, %v1544_v51  ;;  %v221_v53 = vpop.f32.mrb[3].mxu0 }
 0x196   :  { %v1365_v54 = vmul.f32 -1.442695, %v221_v53 }
 0x197   :  { %1710 = vpow2.f32 %v1366_v52 }
 0x198   :  { %1712 = vpow2.f32 %v1365_v54  ;;  %v1547_v55 = vpop.f32.mrb[4].mxu0  ;;  %v66_v54 = vld [vmem:[%s2461_s1 + $0x18] sm:$0xff] }
 0x199   :  { %v231_v56 = vpop.f32.mrb[5].mxu0  ;;  %v1368_v57 = vmul.f32 -1.442695, %v1547_v55 }
 0x19a   :  { %v1367_v58 = vmul.f32 -1.442695, %v231_v56 }
 0x19c   :  { %1714 = vpow2.f32 %v1367_v58  ;;  %v1550_v59 = vpop.f32.mrb[6].mxu0 }
 0x19d   :  { %v1707_v60 = vpop.eup %1706  ;;  %v241_v61 = vpop.f32.mrb[7].mxu0  ;;  %1716 = vpow2.f32 %v1368_v57  ;;  %v1370_v16 = vmul.f32 -1.442695, %v1550_v59  ;;  %v65_v59 = vld [vmem:[%s2461_s1 + $0x10] sm:$0xff] }
 0x19e   :  { %v1709_v62 = vpop.eup %1708  ;;  %v275_v63 = vadd.f32 1.0, %v1707_v60  ;;  %v1369_v3 = vmul.f32 -1.442695, %v241_v61 }
 0x19f   :  { %v274_v7 = vadd.f32 1.0, %v1709_v62  ;;  %v67_v62 = vld [vmem:[%s2461_s1 + $0x20] sm:$0xff] }
 0x1a0   :  { %1718 = vrcp.f32 %v275_v63 }
 0x1a1   :  { %v1711_v10 = vpop.eup %1710  ;;  %1720 = vrcp.f32 %v274_v7 }
 0x1a2   :  { %v1713_v11 = vpop.eup %1712  ;;  %1722 = vpow2.f32 %v1369_v3  ;;  %v277_v17 = vadd.f32 1.0, %v1711_v10  ;;  %v70_v3 = vld [vmem:[%s2461_s1 + $0x38] sm:$0xff] }
 0x1a3   :  { %v276_v22 = vadd.f32 1.0, %v1713_v11  ;;  %v69_v11 = vld [vmem:[%s2461_s1 + $0x30] sm:$0xff] }
 0x1a5   :  { %1724 = vrcp.f32 %v276_v22 }
 0x1a6   :  { %v1715_v23 = vpop.eup %1714  ;;  %1726 = vpow2.f32 %v1370_v16 }
 0x1a7   :  { %1728 = vrcp.f32 %v277_v17  ;;  %v278_v24 = vadd.f32 1.0, %v1715_v23  ;;  %v1717_v25 = vpop.eup %1716  ;;  %v72_v17 = vld [vmem:[%s2461_s1 + $0x48] sm:$0xff] }
 0x1a8   :  { %v279_v30 = vadd.f32 1.0, %v1717_v25 }
 0x1a9   :  { %1730 = vrcp.f32 %v278_v24  ;;  %v71_v24 = vld [vmem:[%s2461_s1 + $0x40] sm:$0xff] }
 0x1aa   :  { %v1719_v26 = vpop.eup %1718  ;;  %1732 = vrcp.f32 %v279_v30 }
 0x1ab   :  { %v1721_v29 = vpop.eup %1720  ;;  %305 = vperm.xlu1 %1700, %v1719_v26   ;;  %v74_v26 = vld [vmem:[%s2461_s1 + $0x58] sm:$0xff] }
 0x1ac   :  { %v1723_v34 = vpop.eup %1722  ;;  %300 = vperm.xlu0 %1699, %v1721_v29   ;;  %v73_v29 = vld [vmem:[%s2461_s1 + $0x50] sm:$0xff] }
 0x1ad   :  { %v280_v38 = vadd.f32 1.0, %v1723_v34  ;;  %v75_v34 = vld [vmem:[%s2461_s1 + $0x60] sm:$0xff] }
 0x1af   :  { %v1725_v37 = vpop.eup %1724  ;;  %1734 = vrcp.f32 %v280_v38  ;;  %v77_v38 = vld [vmem:[%s2461_s1 + $0x70] sm:$0xff] }
 0x1b0   :  { %v1727_v39 = vpop.eup %1726  ;;  %518 = vperm.xlu0 %1699, %v510_v36   ;;  %310 = vperm.xlu1 %1700, %v1725_v37   ;;  %v78_v36 = vld [vmem:[%s2461_s1 + $0x78] sm:$0xff] }
 0x1b1   :  { %v1729_v40 = vpop.eup %1728  ;;  %v281_v41 = vadd.f32 1.0, %v1727_v39 }
 0x1b3   :  { %v1731_v42 = vpop.eup %1730  ;;  %1736 = vrcp.f32 %v281_v41 }
 0x1b4   :  { %315 = vperm.xlu1 %1700, %v1729_v40   ;;  %v1733_v43 = vpop.eup %1732  ;;  %v507_v40 = vld [vmem:[%s2463_s3] sm:$0xff] }
 0x1b5   :  { %1567 = vmatprep.mubr.msk.f32.mxu0 %vm120_vm0, %v507_v40  ;;  %v790_v40 = vld [vmem:[%s2466_s6] sm:$0xff] }
 0x1b8   :  { %320 = vperm.xlu1 %1700, %v1731_v42  }
 0x1b9   :  { %v1735_v44 = vpop.eup %1734 }
 0x1bc   :  { %325 = vperm.xlu1 %1700, %v1733_v43  }
 0x1bd   :  { %v1737_v45 = vpop.eup %1736 }
 0x1c0   :  { %330 = vperm.xlu1 %1700, %v1735_v44  }
 0x1c4   :  { %335 = vperm.xlu1 %1700, %v1737_v45  }
 0x1c8   :  { %513 = vperm.xlu1 %1700, %v509_v46  }
 0x22a   :  { %v306_v47 = vpop.permute.xlu1 %305 }
 0x22b   :  { %v301_v49 = vpop.permute.xlu0 %300  ;;  %v341_v51 = vmul.f32 %v306_v47, %v1963_v9  ;;  %v340_v57 = vmul.f32 %v306_v47, %v1958_v8 }
 0x22c   :  { %v338_v52 = vmul.f32 %v301_v49, %v1934_v2  ;;  %v339_v53 = vmul.f32 %v301_v49, %v1941_v4  ;;  %v68_v4 = vld [vmem:[%s2461_s1 + $0x28] sm:$0xff] }
 0x22d   :  { %v2147_v9 = vadd.f32 %v341_v51, %v66_v54  ;;  %v2156_v8 = vadd.f32 %v340_v57, %v65_v59 }
 0x22e   :  { %v2139_v55 = vadd.f32 %v338_v52, %v63_v48  ;;  %v2141_v56 = vadd.f32 %v339_v53, %v64_v50 }
 0x22f   :  { %v311_v58 = vpop.permute.xlu1 %310 }
 0x230   :  { %v343_v2 = vmul.f32 %v311_v58, %v1929_v1  ;;  %466 = vmatprep.mubr.f32.mxu1 %v2141_v56  ;;  %v342_v60 = vmul.f32 %v311_v58, %v1924_v0 }
 0x231   :  { %467 = vmatmul.mubr.f32.vlgmr.msra.gmra.mrb[0].mxu1 %v2139_v55 }
 0x232   :  { %471 = vmatprep.mubr.f32.mxu1 %v2147_v9  ;;  %v2162_v1 = vadd.f32 %v343_v2, %v68_v4  ;;  %v2170_v7 = vadd.f32 %v342_v60, %v67_v62 }
 0x233   :  { %v316_v61 = vpop.permute.xlu1 %315 }
 0x234   :  { %v345_v63 = vmul.f32 %v316_v61, %v1951_v6  ;;  %v344_v0 = vmul.f32 %v316_v61, %v1946_v5 }
 0x235   :  { %472 = vmatmul.mubr.f32.gmra.mrb[2].mxu1 %v2156_v8 }
 0x236   :  { %476 = vmatprep.mubr.f32.mxu1 %v2162_v1  ;;  %v2176_v16 = vadd.f32 %v345_v63, %v70_v3  ;;  %v2184_v22 = vadd.f32 %v344_v0, %v69_v11 }
 0x237   :  { %v321_v10 = vpop.permute.xlu1 %320 }
 0x238   :  { %v347_v6 = vmul.f32 %v321_v10, %v1987_v15  ;;  %v346_v5 = vmul.f32 %v321_v10, %v1982_v14 }
 0x239   :  { %477 = vmatmul.mubr.f32.gmra.mrb[4].mxu1 %v2170_v7 }
 0x23a   :  { %481 = vmatprep.mubr.f32.mxu1 %v2176_v16  ;;  %v2190_v25 = vadd.f32 %v347_v6, %v72_v17  ;;  %v2198_v27 = vadd.f32 %v346_v5, %v71_v24  ;;  %v508_v6 = vld [vmem:[%s2463_s3 + $0x8] sm:$0xff]  ;;  %v604_v17 = vld [vmem:[%s2465_s5] sm:$0xff]  ;;  %v519_v5 = vpop.permute.xlu0 %518  ;;  %s1854_s3 = smov 112  }
 0x23b   :  { %v326_v23 = vpop.permute.xlu1 %325 }
 0x23c   :  { %v349_v15 = vmul.f32 %v326_v23, %v1977_v13  ;;  %v348_v14 = vmul.f32 %v326_v23, %v1972_v12 }
 0x23d   :  { %482 = vmatmul.mubr.f32.gmra.mrb[6].mxu1 %v2184_v22 }
 0x23e   :  { %486 = vmatprep.mubr.f32.mxu1 %v2190_v25  ;;  %v2204_v30 = vadd.f32 %v349_v15, %v74_v26  ;;  %v2212_v32 = vadd.f32 %v348_v14, %v73_v29 }
 0x23f   :  { %v331_v28 = vpop.permute.xlu1 %330 }
 0x240   :  { %v351_v13 = vmul.f32 %v331_v28, %v2011_v21  ;;  %v350_v12 = vmul.f32 %v331_v28, %v2006_v20 }
 0x241   :  { %487 = vmatmul.mubr.f32.gmra.mrb[8].mxu1 %v2198_v27 }
 0x242   :  { %491 = vmatprep.mubr.f32.mxu1 %v2204_v30  ;;  %v2218_v35 = vadd.f32 %v351_v13, %v76_v31  ;;  %v2226_v37 = vadd.f32 %v350_v12, %v75_v34  ;;  %v605_v12 = vld [vmem:[%s2465_s5 + $0x8] sm:$0xff]  ;;  %v607_v34 = vld [vmem:[%s2465_s5 + $0x18] sm:$0xff] }
 0x243   :  { %v336_v33 = vpop.permute.xlu1 %335 }
 0x244   :  { %v353_v21 = vmul.f32 %v336_v33, %v2001_v19  ;;  %v352_v20 = vmul.f32 %v336_v33, %v1996_v18  ;;  %v606_v33 = vld [vmem:[%s2465_s5 + $0x10] sm:$0xff] }
 0x245   :  { %492 = vmatmul.mubr.f32.gmra.mrb[10].mxu1 %v2212_v32 }
 0x246   :  { %496 = vmatprep.mubr.f32.mxu1 %v2218_v35  ;;  %v2232_v39 = vadd.f32 %v353_v21, %v78_v36  ;;  %v2236_v19 = vadd.f32 %v352_v20, %v77_v38  ;;  %v608_v21 = vld [vmem:[%s2465_s5 + $0x20] sm:$0xff]  ;;  %v609_v36 = vld [vmem:[%s2465_s5 + $0x28] sm:$0xff]  ;;  %v610_v20 = vld [vmem:[%s2465_s5 + $0x30] sm:$0xff] }
 0x247   :  { %v514_v24 = vpop.permute.xlu1 %513  ;;  %v611_v38 = vld [vmem:[%s2465_s5 + $0x38] sm:$0xff] }
 0x249   :  { %497 = vmatmul.mubr.f32.gmra.mrb[12].mxu1 %v2226_v37 }
 0x24a   :  { %501 = vmatprep.mubr.f32.mxu1 %v2232_v39 }
 0x24d   :  { %502 = vmatmul.mubr.f32.gmra.mrb[14].mxu1 %v2236_v19 }
 0x304   :  { %v1469_v18 = vpop.f32.mrb[0].mxu1 }
 0x305   :  { %v1470_v41 = vpop.f32.mrb[1].mxu1 }
 0x306   :  { %v1471_v42 = vadd.f32 %v1470_v41, %v1469_v18 }
 0x308   :  { %v1472_v43 = vpop.f32.mrb[2].mxu1 }
 0x309   :  { %v1473_v44 = vpop.f32.mrb[3].mxu1 }
 0x30a   :  { %v1474_v45 = vadd.f32 %v1473_v44, %v1472_v43  ;;  %v791_v44 = vld [vmem:[%s2466_s6 + $0x8] sm:$0xff] }
 0x30c   :  { %v1650_v46 = vpack.c.bf16 %v1474_v45, %v1471_v42  ;;  %v1475_v47 = vpop.f32.mrb[4].mxu1  ;;  %v792_v45 = vld [vmem:[%s2466_s6 + $0x10] sm:$0xff] }
 0x30d   :  { %v1476_v48 = vpop.f32.mrb[5].mxu1 }
 0x30e   :  { %v1477_v49 = vadd.f32 %v1476_v48, %v1475_v47  ;;  %1651 = vmatprep.subr.bf16.mxu0 %v1650_v46  ;;  %v794_v47 = vld [vmem:[%s2466_s6 + $0x20] sm:$0xff]  ;;  %v795_v48 = vld [vmem:[%s2466_s6 + $0x28] sm:$0xff] }
 0x30f   :  { %1653 = vmatpush3.bf16.msra.mxu0 %v1650_v46  ;;  %v793_v46 = vld [vmem:[%s2466_s6 + $0x18] sm:$0xff] }
 0x310   :  { %v1478_v50 = vpop.f32.mrb[6].mxu1 }
 0x311   :  { %v1479_v51 = vpop.f32.mrb[7].mxu1 }
 0x312   :  { %v1480_v52 = vadd.f32 %v1479_v51, %v1478_v50  ;;  %v797_v50 = vld [vmem:[%s2466_s6 + $0x38] sm:$0xff] }
 0x314   :  { %v1654_v53 = vpack.c.bf16 %v1480_v52, %v1477_v49  ;;  %v1481_v54 = vpop.f32.mrb[8].mxu1  ;;  %v796_v49 = vld [vmem:[%s2466_s6 + $0x30] sm:$0xff] }
 0x315   :  { %v1482_v57 = vpop.f32.mrb[9].mxu1 }
 0x316   :  { %v1483_v58 = vadd.f32 %v1482_v57, %v1481_v54  ;;  %1655 = vmatprep.subr.bf16.mxu0 %v1654_v53 }
 0x317   :  { %1657 = vmatpush3.bf16.msra.mxu0 %v1654_v53 }
 0x318   :  { %v1484_v59 = vpop.f32.mrb[10].mxu1 }
 0x319   :  { %v1485_v2 = vpop.f32.mrb[11].mxu1 }
 0x31a   :  { %v1486_v4 = vadd.f32 %v1485_v2, %v1484_v59 }
 0x31c   :  { %v1658_v60 = vpack.c.bf16 %v1486_v4, %v1483_v58  ;;  %v1487_v61 = vpop.f32.mrb[12].mxu1  ;;  %v1024_v4 = vld [vmem:[%s2468_s8 + $0x8] sm:$0xff] }
 0x31d   :  { %v1488_v62 = vpop.f32.mrb[13].mxu1 }
 0x31e   :  { %v1489_v63 = vadd.f32 %v1488_v62, %v1487_v61  ;;  %1659 = vmatprep.subr.bf16.mxu0 %v1658_v60  ;;  %v1023_v61 = vld [vmem:[%s2468_s8] sm:$0xff] }
 0x31f   :  { %1661 = vmatpush3.bf16.msra.mxu0 %v1658_v60  ;;  %v1028_v60 = vld [vmem:[%s2468_s8 + $0x28] sm:$0xff] }
 0x320   :  { %v1490_v3 = vpop.f32.mrb[14].mxu1  ;;  %v1674_v62 = vpack.c.bf16 %v1028_v60, %v1024_v4 }
 0x321   :  { %v1491_v0 = vpop.f32.mrb[15].mxu1 }
 0x322   :  { %v1492_v10 = vadd.f32 %v1491_v0, %v1490_v3  ;;  %v1026_v3 = vld [vmem:[%s2468_s8 + $0x18] sm:$0xff]  ;;  %1675 = vmatprep.subr.bf16.mxu1 %v1674_v62 }
 0x323   :  { %v1030_v0 = vld [vmem:[%s2468_s8 + $0x38] sm:$0xff] }
 0x324   :  { %v1662_v11 = vpack.c.bf16 %v1492_v10, %v1489_v63  ;;  %v1027_v63 = vld [vmem:[%s2468_s8 + $0x20] sm:$0xff] }
 0x325   :  { %v1676_v10 = vpack.c.bf16 %v1027_v63, %v1023_v61  ;;  %v1855_v63 = vmov 0.0  }
 0x326   :  { %1663 = vmatprep.subr.bf16.mxu0 %v1662_v11  ;;  %1128 = vmatprep.mubr.f32.mxu1 %v1855_v63 }
 0x327   :  { %1665 = vmatpush3.bf16.msra.mxu0 %v1662_v11  ;;  %v1682_v11 = vpack.c.bf16 %v1030_v0, %v1026_v3  ;;  %1677 = vmatpush1.bf16.msra.mxu1 %v1676_v10 }
 0x32a   :  { %1568 = vmatmul.mubr.msk.f32.vlgmr.msra.gmra.mrb[8].mxu0 %vm120_vm0, %v508_v6  ;;  %v1025_v6 = vld [vmem:[%s2468_s8 + $0x10] sm:$0xff] }
 0x32b   :  { %1574 = vmatprep.mubr.msk.f32.mxu0 %vm612_vm1, %v604_v17  ;;  %v1029_v17 = vld [vmem:[%s2468_s8 + $0x30] sm:$0xff] }
 0x3fd   :  { %v1569_v23 = vpop.f32.mrb[8].mxu0 }
 0x3fe   :  { %v599_v15 = vadd.f32 %v1569_v23, %v519_v5  ;;  %v593_v26 = vpop.f32.mrb[9].mxu0  ;;  %v1032_v5 = vld [vmem:[%s2468_s8 + $0x48] sm:$0xff]  ;;  %v1684_v23 = vpack.c.bf16 %v1029_v17, %v1025_v6 }
 0x3ff   :  { %v594_v14 = vadd.f32 %v593_v26, %v514_v24  ;;  %v1036_v24 = vld [vmem:[%s2468_s8 + $0x68] sm:$0xff]  ;;  %v1038_v26 = vld [vmem:[%s2468_s8 + $0x78] sm:$0xff] }
 0x400   :  { %v603_v28 = vmax.f32 %v599_v15, 0.0  ;;  %v1034_v15 = vld [vmem:[%s2468_s8 + $0x58] sm:$0xff] }
 0x401   :  { %v602_v29 = vmax.f32 %v594_v14, 0.0  ;;  %v1678_v14 = vpack.c.bf16 %v1036_v24, %v1032_v5 }
 0x403   :  { %v1701_v13 = vpack.i.bf16 %v603_v28, %v602_v29  ;;  %v1666_v31 = vpack.c.bf16 %v603_v28, %v602_v29  ;;  %v1686_v28 = vpack.c.bf16 %v1038_v26, %v1034_v15  ;;  %v1031_v29 = vld [vmem:[%s2468_s8 + $0x40] sm:$0xff]  ;;  %1679 = vmatprep.subr.bf16.mxu1 %v1678_v14 }
 0x405   :  { %1702 = vrot.lane.b32.xlu1 %v1701_v13, %s1854_s3  ;;  %1667 = vmatprep.subr.bf16.mxu0 %v1666_v31  ;;  %v1035_v13 = vld [vmem:[%s2468_s8 + $0x60] sm:$0xff] }
 0x406   :  { %1669 = vmatpush3.bf16.msra.mxu0 %v1666_v31  ;;  %v1033_v31 = vld [vmem:[%s2468_s8 + $0x50] sm:$0xff] }
 0x409   :  { %1575 = vmatmul.mubr.msk.f32.vlgmr.msra.gmra.mrb[10].mxu0 %vm612_vm1, %v605_v12  ;;  %v1680_v12 = vpack.c.bf16 %v1035_v13, %v1031_v29 }
 0x40a   :  { %1577 = vmatprep.mubr.msk.f32.mxu0 %vm612_vm1, %v606_v33  ;;  %v1037_v33 = vld [vmem:[%s2468_s8 + $0x70] sm:$0xff]  ;;  %s1856_s8 = smov 16  }
 0x40b   :  { %1681 = vmatpush1.bf16.msra.mxu1 %v1680_v12 }
 0x40d   :  { %1578 = vmatmul.mubr.msk.f32.gmra.mrb[12].mxu0 %vm612_vm1, %v607_v34  ;;  %v1688_v34 = vpack.c.bf16 %v1037_v33, %v1033_v31 }
 0x40e   :  { %1580 = vmatprep.mubr.msk.f32.mxu0 %vm612_vm1, %v608_v21 }
 0x411   :  { %1581 = vmatmul.mubr.msk.f32.gmra.mrb[14].mxu0 %vm612_vm1, %v609_v36 }
 0x412   :  { %1583 = vmatprep.mubr.msk.f32.mxu0 %vm612_vm1, %v610_v20 }
 0x415   :  { %1584 = vmatmul.mubr.msk.f32.gmra.mrb[16].mxu0 %vm612_vm1, %v611_v38 }
 0x416   :  { %1590 = vmatprep.mubr.msk.f32.mxu0 %vm612_vm1, %v790_v40 }
 0x477   :  { %v1703_v18 = vpop.permute.xlu1 %1702 }
 0x478   :  { %v1705_v41 = vunpack.i.h.bf16 %v1703_v18  ;;  %v1704_v42 = vunpack.i.l.bf16 %v1703_v18 }
 0x47a   :  { %v1670_v43 = vpack.c.bf16 %v1705_v41, %v1704_v42 }
 0x47c   :  { %1671 = vmatprep.subr.bf16.mxu0 %v1670_v43 }
 0x47d   :  { %1673 = vmatpush3.bf16.msra.mxu0 %v1670_v43 }
 0x47e   :  { %1683 = vmatprep.subr.bf16.mxu0 %v1682_v11 }
 0x480   :  { %1591 = vmatmul.mubr.msk.f32.vlgmr.msra.gmra.mrb[18].mxu0 %vm612_vm1, %v791_v44 }
 0x481   :  { %1593 = vmatprep.mubr.msk.f32.mxu0 %vm612_vm1, %v792_v45  ;;  %1685 = vmatpush1.bf16.msra.mxu0 %v1684_v23 }
 0x482   :  { %1687 = vmatprep.subr.bf16.mxu0 %v1686_v28 }
 0x484   :  { %1594 = vmatmul.mubr.msk.f32.gmra.mrb[20].mxu0 %vm612_vm1, %v793_v46 }
 0x485   :  { %1596 = vmatprep.mubr.msk.f32.mxu0 %vm612_vm1, %v794_v47  ;;  %1689 = vmatpush1.bf16.msra.mxu0 %v1688_v34 }
 0x488   :  { %1597 = vmatmul.mubr.msk.f32.gmra.mrb[22].mxu0 %vm612_vm1, %v795_v48 }
 0x489   :  { %1599 = vmatprep.mubr.msk.f32.mxu0 %vm612_vm1, %v796_v49 }
 0x48c   :  { %1600 = vmatmul.mubr.msk.f32.gmra.mrb[24].mxu0 %vm612_vm1, %v797_v50 }
 0x48d   :  { %1241 = vmatprep.mubr.f32.mxu0 %v1855_v63 }
 0x4dc   :  { %v2311_v51 = vpop.f32.mrb[10].mxu0 }
 0x4dd   :  { %v2313_v52 = vpop.f32.mrb[11].mxu0 }
 0x4e0   :  { %v2315_v53 = vpop.f32.mrb[12].mxu0 }
 0x4e1   :  { %v2317_v54 = vpop.f32.mrb[13].mxu0 }
 0x4e4   :  { %v2319_v57 = vpop.f32.mrb[14].mxu0 }
 0x4e5   :  { %v2321_v58 = vpop.f32.mrb[15].mxu0 }
 0x4e8   :  { %v2323_v59 = vpop.f32.mrb[16].mxu0 }
 0x4e9   :  { %v2325_v2 = vpop.f32.mrb[17].mxu0 }
 0x553   :  { %v1592_v21 = vpop.f32.mrb[18].mxu0 }
 0x554   :  { %v1398_v36 = vmul.f32 -1.442695, %v1592_v21  ;;  %v896_v20 = vpop.f32.mrb[19].mxu0 }
 0x555   :  { %v1397_v38 = vmul.f32 -1.442695, %v896_v20  ;;  %v1382_v20 = vmul.f32 -1.442695, %v2311_v51  ;;  %v1387_v51 = vmul.f32 -1.442695, %v2325_v2 }
 0x556   :  { %1738 = vpow2.f32 %v1398_v36  ;;  %v1381_v36 = vmul.f32 -1.442695, %v2313_v52 }
 0x557   :  { %1740 = vpow2.f32 %v1397_v38  ;;  %v1595_v40 = vpop.f32.mrb[20].mxu0  ;;  %v1383_v38 = vmul.f32 -1.442695, %v2317_v54 }
 0x558   :  { %v1400_v18 = vmul.f32 -1.442695, %v1595_v40  ;;  %v906_v41 = vpop.f32.mrb[21].mxu0  ;;  %v1384_v40 = vmul.f32 -1.442695, %v2315_v53 }
 0x559   :  { %v1399_v42 = vmul.f32 -1.442695, %v906_v41  ;;  %v1385_v41 = vmul.f32 -1.442695, %v2321_v58  ;;  %v1388_v53 = vmul.f32 -1.442695, %v2323_v59 }
 0x55a   :  { %1742 = vpow2.f32 %v1400_v18 }
 0x55b   :  { %1744 = vpow2.f32 %v1399_v42  ;;  %v1598_v43 = vpop.f32.mrb[22].mxu0 }
 0x55c   :  { %v1402_v44 = vmul.f32 -1.442695, %v1598_v43  ;;  %v916_v45 = vpop.f32.mrb[23].mxu0 }
 0x55d   :  { %v1401_v46 = vmul.f32 -1.442695, %v916_v45 }
 0x55e   :  { %1746 = vpow2.f32 %v1402_v44  ;;  %v1386_v44 = vmul.f32 -1.442695, %v2319_v57 }
 0x55f   :  { %1748 = vpow2.f32 %v1401_v46  ;;  %v1601_v47 = vpop.f32.mrb[24].mxu0 }
 0x560   :  { %v1739_v48 = vpop.eup %1738  ;;  %v1404_v49 = vmul.f32 -1.442695, %v1601_v47  ;;  %v926_v50 = vpop.f32.mrb[25].mxu0 }
 0x561   :  { %v1741_v4 = vpop.eup %1740  ;;  %v960_v60 = vadd.f32 1.0, %v1739_v48  ;;  %v1403_v61 = vmul.f32 -1.442695, %v926_v50 }
 0x562   :  { %v959_v62 = vadd.f32 1.0, %v1741_v4  ;;  %1750 = vpow2.f32 %v1404_v49 }
 0x563   :  { %1752 = vrcp.f32 %v960_v60 }
 0x564   :  { %v1743_v3 = vpop.eup %1742  ;;  %1754 = vrcp.f32 %v959_v62 }
 0x565   :  { %v1745_v0 = vpop.eup %1744  ;;  %v962_v10 = vadd.f32 1.0, %v1743_v3  ;;  %1756 = vpow2.f32 %v1403_v61 }
 0x566   :  { %v961_v11 = vadd.f32 1.0, %v1745_v0 }
 0x567   :  { %1758 = vrcp.f32 %v962_v10 }
 0x568   :  { %v1747_v6 = vpop.eup %1746  ;;  %1760 = vrcp.f32 %v961_v11 }
 0x569   :  { %v1749_v17 = vpop.eup %1748  ;;  %v964_v5 = vadd.f32 1.0, %v1747_v6 }
 0x56a   :  { %v963_v23 = vadd.f32 1.0, %v1749_v17 }
 0x56b   :  { %1762 = vrcp.f32 %v964_v5 }
 0x56c   :  { %v1751_v24 = vpop.eup %1750  ;;  %1764 = vrcp.f32 %v963_v23 }
 0x56d   :  { %v1753_v15 = vpop.eup %1752  ;;  %v966_v26 = vadd.f32 1.0, %v1751_v24 }
 0x56e   :  { %v1755_v14 = vpop.eup %1754  ;;  %993 = vrot.lane.b32.xlu1 %v1753_v15, %s1856_s8 }
 0x56f   :  { %v1757_v28 = vpop.eup %1756  ;;  %1766 = vrcp.f32 %v966_v26  ;;  %991 = vrot.lane.b32.xlu0 %v1755_v14, %s1856_s8 }
 0x570   :  { %v965_v29 = vadd.f32 1.0, %v1757_v28 }
 0x571   :  { %v1759_v13 = vpop.eup %1758 }
 0x572   :  { %v1761_v31 = vpop.eup %1760  ;;  %1768 = vrcp.f32 %v965_v29  ;;  %997 = vrot.lane.b32.xlu1 %v1759_v13, %s1856_s8 }
 0x573   :  { %995 = vrot.lane.b32.xlu0 %v1761_v31, %s1856_s8  ;;  %1770 = vpow2.f32 %v1381_v36 }
 0x574   :  { %1772 = vpow2.f32 %v1382_v20 }
 0x575   :  { %v1763_v12 = vpop.eup %1762  ;;  %1774 = vpow2.f32 %v1383_v38 }
 0x576   :  { %v1765_v33 = vpop.eup %1764  ;;  %1001 = vrot.lane.b32.xlu1 %v1763_v12, %s1856_s8  ;;  %1776 = vpow2.f32 %v1384_v40 }
 0x577   :  { %999 = vrot.lane.b32.xlu0 %v1765_v33, %s1856_s8  ;;  %1778 = vpow2.f32 %v1385_v41 }
 0x579   :  { %v1767_v34 = vpop.eup %1766 }
 0x57a   :  { %1005 = vrot.lane.b32.xlu1 %v1767_v34, %s1856_s8 }
 0x57c   :  { %v1769_v21 = vpop.eup %1768 }
 0x57d   :  { %1003 = vrot.lane.b32.xlu0 %v1769_v21, %s1856_s8  ;;  %v1771_v18 = vpop.eup %1770 }
 0x57e   :  { %v766_v42 = vadd.f32 1.0, %v1771_v18  ;;  %v1773_v43 = vpop.eup %1772 }
 0x57f   :  { %v767_v45 = vadd.f32 1.0, %v1773_v43  ;;  %v1775_v52 = vpop.eup %1774 }
 0x580   :  { %1780 = vrcp.f32 %v766_v42  ;;  %v768_v54 = vadd.f32 1.0, %v1775_v52  ;;  %v1777_v46 = vpop.eup %1776 }
 0x581   :  { %1782 = vpow2.f32 %v1386_v44  ;;  %v769_v47 = vadd.f32 1.0, %v1777_v46  ;;  %v1779_v58 = vpop.eup %1778 }
 0x582   :  { %1784 = vrcp.f32 %v767_v45  ;;  %v770_v50 = vadd.f32 1.0, %v1779_v58 }
 0x583   :  { %1786 = vpow2.f32 %v1387_v51 }
 0x584   :  { %1788 = vrcp.f32 %v768_v54 }
 0x585   :  { %1790 = vpow2.f32 %v1388_v53 }
 0x586   :  { %1792 = vrcp.f32 %v769_v47 }
 0x587   :  { %1794 = vrcp.f32 %v770_v50 }
 0x58a   :  { %v1781_v48 = vpop.eup %1780 }
 0x58b   :  { %v1783_v2 = vpop.eup %1782 }
 0x58c   :  { %v1785_v59 = vpop.eup %1784  ;;  %v771_v61 = vadd.f32 1.0, %v1783_v2 }
 0x58d   :  { %v1787_v3 = vpop.eup %1786 }
 0x58e   :  { %v1789_v0 = vpop.eup %1788  ;;  %1796 = vrcp.f32 %v771_v61  ;;  %v772_v11 = vadd.f32 1.0, %v1787_v3 }
 0x58f   :  { %v1791_v17 = vpop.eup %1790 }
 0x590   :  { %v1793_v5 = vpop.eup %1792  ;;  %v773_v24 = vadd.f32 1.0, %v1791_v17  ;;  %1798 = vrcp.f32 %v772_v11 }
 0x591   :  { %v1795_v26 = vpop.eup %1794 }
 0x592   :  { %1800 = vrcp.f32 %v773_v24 }
 0x598   :  { %v1797_v29 = vpop.eup %1796 }
 0x59a   :  { %v1799_v12 = vpop.eup %1798 }
 0x59c   :  { %v1801_v21 = vpop.eup %1800 }
 0x5e0   :  { %v994_v4 = vpop.permute.xlu1 %993 }
 0x5e1   :  { %v992_v49 = vpop.permute.xlu0 %991  ;;  %v1016_v60 = vsel %vm612_vm1, %v1785_v59, %v994_v4 }
 0x5e2   :  { %v1015_v57 = vsel %vm612_vm1, %v1781_v48, %v992_v49 }
 0x5e3   :  { %1405 = vmatmul.mubr.msk.f32.vlgmr.msra.gmra.mrb[16].mxu1 %vm1039_vm2, %v1015_v57  ;;  %1413 = vmatmul.mubr.msk.f32.vlgmr.msra.gmra.mrb[26].mxu0 %vm1039_vm2, %v1015_v57 }
 0x5e4   :  { %1134 = vmatprep.mubr.f32.mxu1 %v1855_v63  ;;  %1247 = vmatprep.mubr.f32.mxu0 %v1855_v63  ;;  %v998_v6 = vpop.permute.xlu1 %997 }
 0x5e5   :  { %v996_v62 = vpop.permute.xlu0 %995  ;;  %v1018_v23 = vsel %vm612_vm1, %v1793_v5, %v998_v6 }
 0x5e6   :  { %v1017_v10 = vsel %vm612_vm1, %v1789_v0, %v996_v62 }
 0x5e7   :  { %1406 = vmatmul.mubr.msk.f32.gmra.mrb[18].mxu1 %vm1039_vm2, %v1016_v60  ;;  %1414 = vmatmul.mubr.msk.f32.gmra.mrb[28].mxu0 %vm1039_vm2, %v1016_v60 }
 0x5e8   :  { %1140 = vmatprep.mubr.f32.mxu1 %v1855_v63  ;;  %1253 = vmatprep.mubr.f32.mxu0 %v1855_v63  ;;  %v1002_v28 = vpop.permute.xlu1 %1001 }
 0x5e9   :  { %v1000_v15 = vpop.permute.xlu0 %999  ;;  %v1020_v13 = vsel %vm612_vm1, %v1797_v29, %v1002_v28 }
 0x5ea   :  { %v1019_v14 = vsel %vm612_vm1, %v1795_v26, %v1000_v15 }
 0x5eb   :  { %1407 = vmatmul.mubr.msk.f32.gmra.mrb[20].mxu1 %vm1039_vm2, %v1017_v10  ;;  %1415 = vmatmul.mubr.msk.f32.gmra.mrb[30].mxu0 %vm1039_vm2, %v1017_v10 }
 0x5ec   :  { %1146 = vmatprep.mubr.f32.mxu1 %v1855_v63  ;;  %1259 = vmatprep.mubr.f32.mxu0 %v1855_v63  ;;  %v1006_v34 = vpop.permute.xlu1 %1005 }
 0x5ed   :  { %v1022_v36 = vsel %vm612_vm1, %v1801_v21, %v1006_v34 }
 0x5ef   :  { %1408 = vmatmul.mubr.msk.f32.gmra.mrb[22].mxu1 %vm1039_vm2, %v1018_v23  ;;  %1416 = vmatmul.mubr.msk.f32.gmra.mrb[32].mxu0 %vm1039_vm2, %v1018_v23  ;;  %v1004_v31 = vpop.permute.xlu0 %1003 }
 0x5f0   :  { %1152 = vmatprep.mubr.f32.mxu1 %v1855_v63  ;;  %1265 = vmatprep.mubr.f32.mxu0 %v1855_v63  ;;  %v1021_v33 = vsel %vm612_vm1, %v1799_v12, %v1004_v31 }
 0x5f3   :  { %1409 = vmatmul.mubr.msk.f32.gmra.mrb[24].mxu1 %vm1039_vm2, %v1019_v14  ;;  %1417 = vmatmul.mubr.msk.f32.gmra.mrb[34].mxu0 %vm1039_vm2, %v1019_v14 }
 0x5f4   :  { %1158 = vmatprep.mubr.f32.mxu1 %v1855_v63  ;;  %1271 = vmatprep.mubr.f32.mxu0 %v1855_v63 }
 0x5f7   :  { %1410 = vmatmul.mubr.msk.f32.gmra.mrb[26].mxu1 %vm1039_vm2, %v1020_v13  ;;  %1418 = vmatmul.mubr.msk.f32.gmra.mrb[36].mxu0 %vm1039_vm2, %v1020_v13 }
 0x5f8   :  { %1164 = vmatprep.mubr.f32.mxu1 %v1855_v63  ;;  %1277 = vmatprep.mubr.f32.mxu0 %v1855_v63 }
 0x5fb   :  { %1411 = vmatmul.mubr.msk.f32.gmra.mrb[28].mxu1 %vm1039_vm2, %v1021_v33  ;;  %1419 = vmatmul.mubr.msk.f32.gmra.mrb[38].mxu0 %vm1039_vm2, %v1021_v33 }
 0x5fc   :  { %1170 = vmatprep.mubr.f32.mxu1 %v1855_v63  ;;  %1283 = vmatprep.mubr.f32.mxu0 %v1855_v63 }
 0x5ff   :  { %1412 = vmatmul.mubr.msk.f32.gmra.mrb[30].mxu1 %vm1039_vm2, %v1022_v36  ;;  %1420 = vmatmul.mubr.msk.f32.gmra.mrb[40].mxu0 %vm1039_vm2, %v1022_v36 }
 0x6b6   :  { %v1130_v20 = vpop.f32.mrb[16].mxu1  ;;  %v1243_v38 = vpop.f32.mrb[26].mxu0 }
 0x6b7   :  { %v1290_v40 = vmul.f32 %v1130_v20, %v2139_v55  ;;  %v1132_v18 = vpop.f32.mrb[17].mxu1  ;;  %v1245_v41 = vpop.f32.mrb[27].mxu0 }
 0x6b8   :  { %v1291_v42 = vmul.f32 %v1132_v18, %v2141_v56 }
 0x6b9   :  { %v1306_v43 = vmul.f32 %v1290_v40, %v1243_v38 }
 0x6ba   :  { %v1307_v44 = vmul.f32 %v1291_v42, %v1245_v41  ;;  %v1136_v45 = vpop.f32.mrb[18].mxu1  ;;  %v1249_v52 = vpop.f32.mrb[28].mxu0 }
 0x6bb   :  { %1322 = vst [vmem:[#allocation5] sm:$0xff] %v1306_v43  ;;  %v1292_v63 = vmul.f32 %v1136_v45, %v2156_v8  ;;  %v1138_v51 = vpop.f32.mrb[19].mxu1  ;;  %v1251_v54 = vpop.f32.mrb[29].mxu0 }
 0x6bc   :  { %1323 = vst [vmem:[#allocation5 + $0x8] sm:$0xff] %v1307_v44  ;;  %v1293_v46 = vmul.f32 %v1138_v51, %v2147_v9 }
 0x6bd   :  { %v1308_v53 = vmul.f32 %v1292_v63, %v1249_v52 }
 0x6be   :  { %v1309_v47 = vmul.f32 %v1293_v46, %v1251_v54  ;;  %v1142_v58 = vpop.f32.mrb[20].mxu1  ;;  %v1255_v55 = vpop.f32.mrb[30].mxu0 }
 0x6bf   :  { %1324 = vst [vmem:[#allocation5 + $0x10] sm:$0xff] %v1308_v53  ;;  %v1294_v48 = vmul.f32 %v1142_v58, %v2170_v7  ;;  %v1144_v56 = vpop.f32.mrb[21].mxu1  ;;  %v1257_v49 = vpop.f32.mrb[31].mxu0 }
 0x6c0   :  { %1325 = vst [vmem:[#allocation5 + $0x18] sm:$0xff] %v1309_v47  ;;  %v1295_v57 = vmul.f32 %v1144_v56, %v2162_v1 }
 0x6c1   :  { %v1310_v50 = vmul.f32 %v1294_v48, %v1255_v55 }
 0x6c2   :  { %v1311_v4 = vmul.f32 %v1295_v57, %v1257_v49  ;;  %v1148_v8 = vpop.f32.mrb[22].mxu1  ;;  %v1261_v2 = vpop.f32.mrb[32].mxu0 }
 0x6c3   :  { %1326 = vst [vmem:[#allocation5 + $0x20] sm:$0xff] %v1310_v50  ;;  %v1296_v59 = vmul.f32 %v1148_v8, %v2184_v22  ;;  %v1150_v9 = vpop.f32.mrb[23].mxu1  ;;  %v1263_v60 = vpop.f32.mrb[33].mxu0 }
 0x6c4   :  { %1327 = vst [vmem:[#allocation5 + $0x28] sm:$0xff] %v1311_v4  ;;  %v1297_v61 = vmul.f32 %v1150_v9, %v2176_v16 }
 0x6c5   :  { %v1312_v62 = vmul.f32 %v1296_v59, %v1261_v2 }
 0x6c6   :  { %v1313_v3 = vmul.f32 %v1297_v61, %v1263_v60  ;;  %v1154_v7 = vpop.f32.mrb[24].mxu1  ;;  %v1267_v0 = vpop.f32.mrb[34].mxu0 }
 0x6c7   :  { %1328 = vst [vmem:[#allocation5 + $0x30] sm:$0xff] %v1312_v62  ;;  %v1298_v10 = vmul.f32 %v1154_v7, %v2198_v27  ;;  %v1156_v1 = vpop.f32.mrb[25].mxu1  ;;  %v1269_v11 = vpop.f32.mrb[35].mxu0 }
 0x6c8   :  { %1329 = vst [vmem:[#allocation5 + $0x38] sm:$0xff] %v1313_v3  ;;  %v1299_v6 = vmul.f32 %v1156_v1, %v2190_v25 }
 0x6c9   :  { %v1314_v17 = vmul.f32 %v1298_v10, %v1267_v0 }
 0x6ca   :  { %v1315_v5 = vmul.f32 %v1299_v6, %v1269_v11  ;;  %v1160_v22 = vpop.f32.mrb[26].mxu1  ;;  %v1273_v23 = vpop.f32.mrb[36].mxu0 }
 0x6cb   :  { %1330 = vst [vmem:[#allocation5 + $0x40] sm:$0xff] %v1314_v17  ;;  %v1300_v24 = vmul.f32 %v1160_v22, %v2212_v32  ;;  %v1162_v16 = vpop.f32.mrb[27].mxu1  ;;  %v1275_v15 = vpop.f32.mrb[37].mxu0 }
 0x6cc   :  { %1331 = vst [vmem:[#allocation5 + $0x48] sm:$0xff] %v1315_v5  ;;  %v1301_v26 = vmul.f32 %v1162_v16, %v2204_v30 }
 0x6cd   :  { %v1316_v14 = vmul.f32 %v1300_v24, %v1273_v23 }
 0x6ce   :  { %v1317_v28 = vmul.f32 %v1301_v26, %v1275_v15  ;;  %v1166_v27 = vpop.f32.mrb[28].mxu1  ;;  %v1279_v29 = vpop.f32.mrb[38].mxu0 }
 0x6cf   :  { %1332 = vst [vmem:[#allocation5 + $0x50] sm:$0xff] %v1316_v14  ;;  %v1302_v13 = vmul.f32 %v1166_v27, %v2226_v37  ;;  %v1168_v25 = vpop.f32.mrb[29].mxu1  ;;  %v1281_v31 = vpop.f32.mrb[39].mxu0 }
 0x6d0   :  { %1333 = vst [vmem:[#allocation5 + $0x58] sm:$0xff] %v1317_v28  ;;  %v1303_v12 = vmul.f32 %v1168_v25, %v2218_v35 }
 0x6d1   :  { %v1318_v33 = vmul.f32 %v1302_v13, %v1279_v29 }
 0x6d2   :  { %v1319_v34 = vmul.f32 %v1303_v12, %v1281_v31  ;;  %v1172_v32 = vpop.f32.mrb[30].mxu1  ;;  %v1285_v21 = vpop.f32.mrb[40].mxu0 }
 0x6d3   :  { %1334 = vst [vmem:[#allocation5 + $0x60] sm:$0xff] %v1318_v33  ;;  %v1304_v36 = vmul.f32 %v1172_v32, %v2236_v19  ;;  %v1174_v30 = vpop.f32.mrb[31].mxu1  ;;  %v1287_v20 = vpop.f32.mrb[41].mxu0 }
 0x6d4   :  { %1335 = vst [vmem:[#allocation5 + $0x68] sm:$0xff] %v1319_v34  ;;  %v1305_v38 = vmul.f32 %v1174_v30, %v2232_v39 }
 0x6d5   :  { %v1320_v37 = vmul.f32 %v1304_v36, %v1285_v21 }
 0x6d6   :  { %v1321_v40 = vmul.f32 %v1305_v38, %v1287_v20 }
 0x6d7   :  { %1336 = vst [vmem:[#allocation5 + $0x70] sm:$0xff] %v1320_v37 }
 0x6d8   :  { %1337 = vst [vmem:[#allocation5 + $0x78] sm:$0xff] %v1321_v40 }
 0x6d9   :  { %1835 = shalt.err (!%p1832_p12)
}
 0x6da   :  { %s1836_s28 = scalar_lea.hbm %s2469_s9, 2048 }
 0x6db   :  { %p1837_p13 = scmp.ne.s32.totalorder %s2469_s9, %s1836_s28  ;;  %p1840_p0 = scmp.lt.u32.totalorder %s1836_s28, %s2469_s9 }
 0x6dd   :  { %p1842_p1 = pnand %p1840_p0, %p1837_p13 }
 0x6df   :  { %1845 = shalt.err (!%p1842_p1)
}
 0x6e0   :  { %s1858_s10 = smov 256  }
 0x6e1   :  { %1349 = dma.vmem_to_hbm [thread:$0]  %s1344_s24, 2048, %s2469_s9, [#allocation4], %s1858_s10, %s1858_s10, %s1856_s8  }
 0x6e2   :  { %1848 = dma.done.wait [#allocation4], 2048  }
 0x6e3   :  { %1849 = vsyncadd [#allocation4], 4294965248 }
 0x6e4   :  { %1353 = vsyncpa [#allocation3], 1 }
 0x6e5   :  { %1354 = vsyncpa [#allocation4], 1 }

</bundles_post_ra>
